<compile_context>
chip_gen: v6e
topology: v6e:2x2x1
jax: 0.10.0
libtpu: 0.0.40
codegen_flags: <defaults>
</compile_context>

<pallas_src>
import jax
import jax.numpy as jnp
from jax.experimental import pallas as pl
from jax.experimental.pallas import tpu as pltpu


def _spatial_attn_kernel(x_ref, w_ref, o_ref):
    # x_ref/o_ref: (nb, C, T) block of the (N, C, HW) activation.
    # w_ref:       (1, C) 1x1-conv weight, kept in f32 at rest.
    x = x_ref[...]                                   # input dtype, no upcast
    nb, C, _ = x.shape
    # 1x1 conv == contraction over C.  Do it on the MXU (idle in a mem-bound
    # kernel) with f32 accumulation instead of upcasting the whole block.
    w = jnp.broadcast_to(w_ref[...].astype(x.dtype), (nb, 1, C))
    z = jax.lax.dot_general(
        w, x,
        dimension_numbers=(((2,), (1,)), ((0,), (0,))),
        preferred_element_type=jnp.float32,
    )                                                # (nb, 1, T) f32
    s = jax.nn.sigmoid(z)                            # EUP transcendental
    # Elementwise multiply in the input dtype; broadcast over channels.
    o_ref[...] = (x * s.astype(x.dtype)).astype(o_ref.dtype)


def _cdiv(a, b):
    return -(-a // b)


def _largest_divisor_leq(n, cap):
    cap = max(1, min(n, cap))
    for d in range(cap, 0, -1):
        if n % d == 0:
            return d
    return 1


def _tpu_info():
    """(vmem_capacity_bytes, is_fast_chip).  Defensive: works off-TPU too."""
    vmem_bytes = 128 * 1024 * 1024
    try:
        vmem_bytes = int(pltpu.get_tpu_info().vmem_capacity_bytes)
    except Exception:
        pass
    # v7x-like: 64 MiB per-TC VMEM, 2 TensorCores, ~3.2 TB/s HBM -> larger
    # tiles and a higher minimum grid-step count.
    fast = vmem_bytes <= 64 * 1024 * 1024
    return vmem_bytes, fast


def _choose_tiling(N, C, HW, itemsize):
    """Pick (nb, t_hw, vmem_limit_bytes).

    Policy:
      * per-buffer block capped at ~2 MiB (v5e/v6e) / ~4 MiB (v7x),
      * >= 4 (v5e/v6e) / >= 8 (v7x) grid steps unless the problem is tiny,
      * fold batch only when HW fits one tile, using a divisor of N,
      * vmem_limit sized from the actual pipeline footprint + headroom.
    """
    vmem_bytes, fast = _tpu_info()
    blk_target = (4 << 20) if fast else (2 << 20)
    lane_cap = 4096 if fast else 1024

    hw_pad = _cdiv(HW, 128) * 128
    c_pad = _cdiv(C, 8) * 8
    bytes_per_lane = c_pad * itemsize

    # Largest lane count per tile allowed by the per-buffer byte budget.
    t_cap = (blk_target // bytes_per_lane) // 128 * 128
    t_cap = max(128, min(lane_cap, t_cap))
    # TODO(synk): add a C-tiled reduction grid for very large channel counts
    # where even a 128-lane block (C*128*itemsize) would not fit in VMEM.

    total_bytes = N * bytes_per_lane * hw_pad
    tiny = total_bytes <= blk_target // 2
    min_steps = 1 if tiny else (8 if fast else 4)

    if hw_pad > t_cap:
        # HW needs several tiles anyway; keep batch un-folded.
        nb = 1
        n_hw = _cdiv(hw_pad, t_cap)
        if N * n_hw < min_steps:
            n_hw = min(hw_pad // 128, max(n_hw, _cdiv(min_steps, N)))
        t_hw = _cdiv(_cdiv(hw_pad, n_hw), 128) * 128
    else:
        # Whole spatial extent fits in one lane-dense tile.
        t_hw = HW
        nb_cap = max(1, blk_target // (bytes_per_lane * hw_pad))
        if not tiny:
            nb_cap = min(nb_cap, max(1, N // min_steps))
        nb_cap = min(nb_cap, 64)  # bound the in-kernel batched-matmul extent
        nb = _largest_divisor_leq(N, nb_cap)
        steps = _cdiv(N, nb)
        if steps < min_steps and hw_pad >= 256:
            # Split HW to reach the minimum step count (tiles stay lane-dense).
            n_hw = min(hw_pad // 128, _cdiv(min_steps, steps))
            t_hw = _cdiv(_cdiv(hw_pad, n_hw), 128) * 128

    t_lanes = min(_cdiv(t_hw, 128) * 128, hw_pad)
    blk_bytes = nb * bytes_per_lane * t_lanes
    # Double-buffered input + output blocks, plus weight/scratch headroom.
    vmem_limit = 4 * blk_bytes + (8 << 20)
    vmem_limit = max(16 << 20, min(vmem_limit, (vmem_bytes * 3) // 4))
    return nb, t_hw, int(vmem_limit)


def spatial_attention_2d2(x_nchw, weight):
    """x_nchw: (N, C, H, W); weight: (1, C, 1, 1) conv weight. Returns (N, C, H, W)."""
    N, C, H, W = x_nchw.shape
    HW = H * W
    x = x_nchw.reshape(N, C, HW)
    w = weight.reshape(1, C).astype(jnp.float32)

    nb, t_hw, vmem_limit = _choose_tiling(N, C, HW, x.dtype.itemsize)
    grid = (pl.cdiv(N, nb), pl.cdiv(HW, t_hw))

    out = pl.pallas_call(
        _spatial_attn_kernel,
        out_shape=jax.ShapeDtypeStruct((N, C, HW), x.dtype),
        grid_spec=pltpu.PrefetchScalarGridSpec(
            num_scalar_prefetch=0,
            grid=grid,
            in_specs=[
                pl.BlockSpec((nb, C, t_hw), lambda n, t: (n, 0, t)),
                pl.BlockSpec((1, C), lambda n, t: (0, 0)),
            ],
            out_specs=pl.BlockSpec((nb, C, t_hw), lambda n, t: (n, 0, t)),
        ),
        compiler_params=pltpu.CompilerParams(
            dimension_semantics=("parallel", "parallel"),
            vmem_limit_bytes=vmem_limit,
        ),
    )(x, w)
    return out.reshape(N, C, H, W)


def _xavier_uniform_conv_weight(key, out_ch, in_ch, kh, kw, dtype=jnp.float32):
    # Matches torch.nn.init.xavier_uniform_ for a Conv2d weight (out,in,kh,kw).
    fan_in = in_ch * kh * kw
    fan_out = out_ch * kh * kw
    bound = (6.0 / (fan_in + fan_out)) ** 0.5
    return jax.random.uniform(
        key, (out_ch, in_ch, kh, kw), dtype=dtype, minval=-bound, maxval=bound
    )


if __name__ == "__main__":
    key = jax.random.PRNGKey(0)
    kx, kw = jax.random.split(key)

    N, C, H, W = 2, 4, 16, 16
    x = jax.random.normal(kx, (N, C, H, W), dtype=jnp.float32)
    weight = _xavier_uniform_conv_weight(kw, 1, C, 1, 1)

    out = spatial_attention_2d2(x, weight)
    out = jax.block_until_ready(out)

    # Pure-JAX reference (same math as the PyTorch module).
    z_ref = jnp.einsum("nchw,c->nhw", x, weight.reshape(C))[:, None, :, :]
    ref = x * jax.nn.sigmoid(z_ref)
    assert out.shape == (N, C, H, W)
    assert jnp.allclose(out, ref, atol=1e-5, rtol=1e-5)

    print("KERNEL_OK")
</pallas_src>

<mosaic_0001>
module attributes {stable_mosaic.version = 11 : i64} {
  func.func @_spatial_attn_kernel(%arg0: i32, %arg1: i32, %arg2: memref<2x4x256xf32, #tpu.memory_space<vmem>>, %arg3: memref<1x4xf32, #tpu.memory_space<vmem>>, %arg4: memref<2x4x256xf32, #tpu.memory_space<vmem>>) attributes {dimension_semantics = [#tpu.dimension_semantics<parallel>, #tpu.dimension_semantics<parallel>], iteration_bounds = array<i64: 1, 1>, scalar_prefetch = 0 : i64, scratch_operands = 0 : i64, tpu.core_type = #tpu.core_type<tc>, window_params = [{transform_indices = @transform_0, window_bounds = array<i64: 2, 4, 256>}, {pipeline_mode = #tpu.pipeline_mode<synchronous>, transform_indices = @transform_1, window_bounds = array<i64: 1, 4>}, {transform_indices = @transform_2, window_bounds = array<i64: 2, 4, 256>}]} {
    %c0 = arith.constant 0 : index
    %c0_0 = arith.constant 0 : index
    %c0_1 = arith.constant 0 : index
    %0 = vector.load %arg2[%c0, %c0_0, %c0_1] : memref<2x4x256xf32, #tpu.memory_space<vmem>>, vector<2x4x256xf32>
    %c0_2 = arith.constant 0 : index
    %c0_3 = arith.constant 0 : index
    %1 = vector.load %arg3[%c0_2, %c0_3] : memref<1x4xf32, #tpu.memory_space<vmem>>, vector<1x4xf32>
    %2 = vector.shape_cast %1 : vector<1x4xf32> to vector<1x1x4xf32>
    %3 = vector.broadcast %2 : vector<1x1x4xf32> to vector<2x1x4xf32>
    %cst = arith.constant dense<0.000000e+00> : vector<2x1x256xf32>
    %4 = tpu.matmul %3, %0, %cst {dimension_numbers = #tpu.dot_dimension_numbers<[2], [1], [1], [2], [0, 0, 0, 1, 1, 2], [0], [0]>} : vector<2x1x4xf32>, vector<2x4x256xf32>, vector<2x1x256xf32> -> vector<2x1x256xf32>
    %5 = arith.negf %4 : vector<2x1x256xf32>
    %6 = math.exp %5 : vector<2x1x256xf32>
    %cst_4 = arith.constant 1.000000e+00 : f32
    %7 = vector.broadcast %cst_4 : f32 to vector<2x1x256xf32>
    %8 = arith.addf %7, %6 : vector<2x1x256xf32>
    %9 = arith.divf %7, %8 : vector<2x1x256xf32>
    %10 = vector.broadcast %9 : vector<2x1x256xf32> to vector<2x4x256xf32>
    %11 = arith.mulf %0, %10 : vector<2x4x256xf32>
    %c0_5 = arith.constant 0 : index
    %c0_6 = arith.constant 0 : index
    %c0_7 = arith.constant 0 : index
    %12 = vector.load %arg4[%c0_5, %c0_6, %c0_7] : memref<2x4x256xf32, #tpu.memory_space<vmem>>, vector<2x4x256xf32>
    tpu.vector_store %arg4[%c0_5, %c0_6, %c0_7], %11 {strides = array<i32>} : memref<2x4x256xf32, #tpu.memory_space<vmem>>, vector<2x4x256xf32>,
    return
  }
  func.func @transform_0(%arg0: i32, %arg1: i32) -> (i32, i32, i32) {
    %c0_i32 = arith.constant 0 : i32
    %c0_i32_0 = arith.constant 0 : i32
    return %arg0, %c0_i32, %arg1 : i32, i32, i32
  }
  func.func @transform_1(%arg0: i32, %arg1: i32) -> (i32, i32) {
    %c0_i32 = arith.constant 0 : i32
    %c0_i32_0 = arith.constant 0 : i32
    %c0_i32_1 = arith.constant 0 : i32
    return %c0_i32, %c0_i32_0 : i32, i32
  }
  func.func @transform_2(%arg0: i32, %arg1: i32) -> (i32, i32, i32) {
    %c0_i32 = arith.constant 0 : i32
    %c0_i32_0 = arith.constant 0 : i32
    return %arg0, %c0_i32, %arg1 : i32, i32, i32
  }
}

</mosaic_0001>

<bundles_post_ra>
// kernel: tpu_custom_call.1
= control target key start
LH: loop header
LB: loop body
LE: loop exit
PB: predicated region body
PF: predicated region fallthrough
CT: control target
= control target key end

     0   :  { %7 = vsyncpa [#allocation3], 0  ;;  %s369_s0 = inlined_call_operand.hbm [shape: f32[2,4,256], index: 0, kind: input, shape index: {}]   ;;  %s370_s1 = inlined_call_operand.vmem [shape: f32[1,4], index: 1, kind: input, shape index: {}]   ;;  %s371_s2 = inlined_call_operand.hbm [shape: f32[2,4,256], index: 2, kind: output, shape index: {}]  }
   0x1   :  { %8 = vsyncpa [#allocation4], 0  ;;  %s334_s9 = smov [#allocation2]  }
   0x2   :  { %s14_s10 = sshll.u32 %s334_s9, 4  ;;  %s15_s10 = int_to_ptr.vmem [resolvable:$true] %s14_s10 }
   0x3   :  { %s298_s11 = scalar_lea.vmem %s15_s10, 256  ;;  %p303_p1 = scmp.lt.s32.totalorder %s15_s10, %s15_s10 }
   0x4   :  { %p299_p0 = scmp.ne.s32.totalorder %s15_s10, %s298_s11  ;;  %p304_p2 = scmp.lt.s32.totalorder %s298_s11, %s298_s11 }
   0x6   :  { %p305_p3 = por %p304_p2, %p303_p1 }
   0x8   :  { %p306_p4 = pnand %p305_p3, %p299_p0 }
   0xa   :  { %309 = shalt.err (!%p306_p4)
}
   0xb   :  { %s335_s12 = smov 128   ;;  %s336_s13 = smov 8  }
   0xc   :  { %20 = dma.hbm_to_vmem [thread:$0]  %s369_s0, 256, %s15_s10, [#allocation3], %s335_s12, %s335_s12, %s336_s13  }
   0xd   :  { %330 = dma.done.wait [#allocation3], 256  }
   0xe   :  { %331 = vsyncadd [#allocation3], 4294967040  ;;  %v337_v0 = vmov 0.0   ;;  %v26_v1 = vld [vmem:[#allocation2] sm:$0xff]  ;;  %vm35_vm0 = vcmask 1043456   ;;  %v27_v2 = vld [vmem:[#allocation2 + $0x8] sm:$0xff]  ;;  %v212_v22 = vlaneseq }
   0xf   :  { %104 = vmatprep.mubr.f32.mxu0 %v337_v0  ;;  %181 = vmatprep.mubr.f32.mxu1 %v337_v0  ;;  %v30_v3 = vcombine.high %v26_v1, %v26_v1  ;;  %v112_v4 = vcombine.high %v27_v2, %v27_v2  ;;  %v28_v5 = vld [vmem:[%s370_s1] sm:$0x1]  ;;  %vm31_vm1 = vcmask 31744   ;;  %s338_s0 = smov [#allocation5]  }
  0x10   :  { %v213_v23 = vshrl.u32 %v212_v22, 7  ;;  %s245_s1 = sshll.u32 %s338_s0, 4  ;;  %s246_s1 = int_to_ptr.vmem [resolvable:$true] %s245_s1 }
  0x11   :  { %257 = vmatprep.subr.msk.mxu0 %vm35_vm0, %v30_v3  ;;  %260 = vmatprep.subr.msk.mxu1 %vm35_vm0, %v112_v4  ;;  %s310_s18 = scalar_lea.vmem %s246_s1, 256  ;;  %p315_p6 = scmp.lt.s32.totalorder %s246_s1, %s246_s1 }
  0x12   :  { %258 = vmatpush1.msk.msra.mxu0 %vm35_vm0, %v26_v1  ;;  %261 = vmatpush1.msk.msra.mxu1 %vm35_vm0, %v27_v2  ;;  %v214_v24 = vsub.s32 0, %v213_v23  ;;  %p311_p5 = scmp.ne.s32.totalorder %s246_s1, %s310_s18  ;;  %p316_p7 = scmp.lt.s32.totalorder %s310_s18, %s310_s18 }
  0x13   :  { %259 = vmatmul.mubr.msk.f32.vlgmr.msra.gmra.mxu0 %vm31_vm1, %v28_v5  ;;  %262 = vmatmul.mubr.msk.f32.vlgmr.msra.gmra.mxu1 %vm31_vm1, %v28_v5 }
  0x14   :  { %p317_p8 = por %p316_p7, %p315_p6 }
  0x16   :  { %p318_p9 = pnand %p317_p8, %p311_p5 }
  0xd3   :  { %v106_v6 = vpop.f32.mrf.mxu0  ;;  %v183_v7 = vpop.f32.mrf.mxu1 }
  0xd4   :  { %v263_v8 = vmul.f32 -1.442695, %v106_v6  ;;  %v265_v9 = vmul.f32 -1.442695, %v183_v7 }
  0xd5   :  { %v108_v10 = vpop.f32.mrf.mxu0  ;;  %v185_v11 = vpop.f32.mrf.mxu1 }
  0xd6   :  { %274 = vpow2.f32 %v263_v8  ;;  %v264_v12 = vmul.f32 -1.442695, %v108_v10  ;;  %v266_v13 = vmul.f32 -1.442695, %v185_v11 }
  0xd7   :  { %276 = vpow2.f32 %v265_v9 }
  0xd8   :  { %278 = vpow2.f32 %v264_v12 }
  0xd9   :  { %280 = vpow2.f32 %v266_v13 }
  0xe3   :  { %v275_v14 = vpop.eup %274 }
  0xe4   :  { %v277_v15 = vpop.eup %276  ;;  %v200_v16 = vadd.f32 1.0, %v275_v14 }
  0xe5   :  { %v279_v17 = vpop.eup %278  ;;  %v202_v18 = vadd.f32 1.0, %v277_v15 }
  0xe6   :  { %v281_v19 = vpop.eup %280  ;;  %282 = vrcp.f32 %v200_v16  ;;  %v201_v20 = vadd.f32 1.0, %v279_v17 }
  0xe7   :  { %284 = vrcp.f32 %v202_v18  ;;  %v203_v21 = vadd.f32 1.0, %v281_v19 }
  0xe8   :  { %286 = vrcp.f32 %v201_v20 }
  0xe9   :  { %288 = vrcp.f32 %v203_v21 }
  0xf3   :  { %v283_v25 = vpop.eup %282 }
  0xf4   :  { %v285_v26 = vpop.eup %284  ;;  %v215_v29 = vrot.slane %v283_v25, %v214_v24 }
  0xf5   :  { %v287_v27 = vpop.eup %286  ;;  %v223_v31 = vrot.slane %v285_v26, %v214_v24 }
  0xf6   :  { %v289_v28 = vpop.eup %288  ;;  %v219_v30 = vrot.slane %v287_v27, %v214_v24 }
  0xf7   :  { %v227_v32 = vrot.slane %v289_v28, %v214_v24 }
  0xf8   :  { %v232_v33 = vcombine.low %v215_v29, %v219_v30 }
  0xf9   :  { %v233_v34 = vcombine.low %v223_v31, %v227_v32 }
  0xfa   :  { %v236_v35 = vmul.f32 %v232_v33, %v26_v1 }
  0xfb   :  { %v237_v36 = vmul.f32 %v233_v34, %v27_v2 }
  0xfc   :  { %238 = vst [vmem:[#allocation5] sm:$0xff] %v236_v35 }
  0xfd   :  { %239 = vst [vmem:[#allocation5 + $0x8] sm:$0xff] %v237_v36 }
  0xfe   :  { %321 = shalt.err (!%p318_p9)
}
  0xff   :  { %251 = dma.vmem_to_hbm [thread:$0]  %s246_s1, 256, %s371_s2, [#allocation4], %s335_s12, %s335_s12, %s336_s13  }
 0x100   :  { %332 = dma.done.wait [#allocation4], 256  }
 0x101   :  { %333 = vsyncadd [#allocation4], 4294967040 }
 0x102   :  { %255 = vsyncpa [#allocation3], 1 }
 0x103   :  { %256 = vsyncpa [#allocation4], 1 }

</bundles_post_ra>
